<compile_context>
chip_gen: v7x
topology: tpu7x:2x2x1
jax: 0.10.0
libtpu: 0.0.40
codegen_flags: <defaults>
</compile_context>

<pallas_src>
import jax
import jax.numpy as jnp
from jax.experimental import pallas as pl
from jax.experimental.pallas import tpu as pltpu

_SQRT_2_OVER_PI = 0.7978845608028654  # sqrt(2/pi) as a Python float
_GELU_COEF = 0.044715


def _gelu_tanh(x):
    # tanh-approximate GELU, matches F.gelu(..., approximate='tanh'); x is f32.
    return 0.5 * x * (1.0 + jnp.tanh(_SQRT_2_OVER_PI * (x + _GELU_COEF * (x * x * x))))


def siglip_mlp_kernel(x_ref, w1_ref, b1_ref, w2_ref, b2_ref, o_ref, acc_ref):
    # x_ref:  (tm, H)    w1_ref: (H, ti)   b1_ref: (1, ti)
    # w2_ref: (ti, H)    b2_ref: (1, H)    o_ref:  (tm, H)
    # acc_ref: (tm, H) f32 scratch, resident across the I (reduction) axis.
    k = pl.program_id(1)

    @pl.when(k == 0)
    def _():
        acc_ref[...] = jnp.zeros_like(acc_ref)

    # fc1 partial: native-dtype operands, f32 accumulation on the MXU.
    h = jnp.dot(x_ref[...], w1_ref[...], preferred_element_type=jnp.float32)
    h = h + b1_ref[...].astype(jnp.float32)
    h = _gelu_tanh(h)

    # fc2 partial, accumulated in f32.
    acc_ref[...] += jnp.dot(h.astype(w2_ref.dtype), w2_ref[...],
                            preferred_element_type=jnp.float32)

    @pl.when(k == pl.num_programs(1) - 1)
    def _():
        out = acc_ref[...] + b2_ref[...].astype(jnp.float32)
        o_ref[...] = out.astype(o_ref.dtype)


def siglip_mlp(hidden_state, w1, b1, w2, b2, *, tm=None, ti=None):
    """Fused SiglipMLP forward.

    hidden_state: [B, S, H]; w1: [H, I] (fc1 weight, pre-transposed);
    b1: [I]; w2: [I, H] (fc2 weight, pre-transposed); b2: [H].
    """
    B, S, H = hidden_state.shape
    I = w1.shape[1]
    M = B * S

    # Tile sizes: MXU-sized for real SigLIP shapes, clamped (8-aligned) for
    # small inputs.  ti < 128 only when a single tile spans all of I.
    if tm is None:
        tm = min(256, ((M + 7) // 8) * 8)
    if ti is None:
        ti = 512 if I >= 512 else I

    Mp = pl.cdiv(M, tm) * tm
    Ip = pl.cdiv(I, ti) * ti

    x2d = hidden_state.reshape(M, H)
    if Mp != M:
        x2d = jnp.pad(x2d, ((0, Mp - M), (0, 0)))
    if Ip != I:
        # Zero padding of the intermediate dim is exact: gelu(0) = 0 and the
        # padded rows of w2 are zero, so padded columns contribute nothing.
        w1 = jnp.pad(w1, ((0, 0), (0, Ip - I)))
        b1 = jnp.pad(b1, ((0, Ip - I),))
        w2 = jnp.pad(w2, ((0, Ip - I), (0, 0)))

    b1_2d = b1.reshape(1, Ip)
    b2_2d = b2.reshape(1, H)

    itemsize = jnp.dtype(hidden_state.dtype).itemsize
    cost = pl.CostEstimate(
        flops=4 * M * H * I,                 # 2*M*H*I per matmul, two matmuls
        transcendentals=M * I,               # one tanh per intermediate element
        bytes_accessed=(M * H + H * I + I + I * H + H + M * H) * itemsize,
    )

    out2d = pl.pallas_call(
        siglip_mlp_kernel,
        out_shape=jax.ShapeDtypeStruct((Mp, H), hidden_state.dtype),
        grid_spec=pltpu.PrefetchScalarGridSpec(
            num_scalar_prefetch=0,
            grid=(Mp // tm, Ip // ti),
            in_specs=[
                pl.BlockSpec((tm, H), lambda i, k: (i, 0)),   # x row tile
                pl.BlockSpec((H, ti), lambda i, k: (0, k)),   # fc1 weight I-slab
                pl.BlockSpec((1, ti), lambda i, k: (0, k)),   # fc1 bias slab
                pl.BlockSpec((ti, H), lambda i, k: (k, 0)),   # fc2 weight I-slab
                pl.BlockSpec((1, H), lambda i, k: (0, 0)),    # fc2 bias
            ],
            out_specs=pl.BlockSpec((tm, H), lambda i, k: (i, 0)),
            scratch_shapes=[pltpu.VMEM((tm, H), jnp.float32)],
        ),
        compiler_params=pltpu.CompilerParams(
            dimension_semantics=("parallel", "arbitrary"),
            vmem_limit_bytes=64 * 1024 * 1024,
        ),
        cost_estimate=cost,
    )(x2d, w1, b1_2d, w2, b2_2d)

    if Mp != M:
        out2d = out2d[:M]
    return out2d.reshape(B, S, H)


def _reference(x, w1, b1, w2, b2):
    ref = jnp.einsum("bsh,hi->bsi", x, w1) + b1
    ref = jax.nn.gelu(ref, approximate=True)
    return jnp.einsum("bsi,ih->bsh", ref, w2) + b2


if __name__ == "__main__":
    # Small synthetic config consistent with SiglipVisionConfig semantics.
    batch, seq = 2, 8
    hidden_size = 32
    intermediate_size = 64

    key = jax.random.PRNGKey(0)
    kx, kw1, kb1, kw2, kb2 = jax.random.split(key, 5)

    x = jax.random.normal(kx, (batch, seq, hidden_size), dtype=jnp.float32)
    # nn.Linear(H, I) has weight (I, H); we pass the transposed (H, I) so the
    # kernel computes x @ W + b directly.
    w1 = jax.random.normal(kw1, (hidden_size, intermediate_size),
                           dtype=jnp.float32) * 0.02
    b1 = jax.random.normal(kb1, (intermediate_size,), dtype=jnp.float32) * 0.02
    w2 = jax.random.normal(kw2, (intermediate_size, hidden_size),
                           dtype=jnp.float32) * 0.02
    b2 = jax.random.normal(kb2, (hidden_size,), dtype=jnp.float32) * 0.02

    out = siglip_mlp(x, w1, b1, w2, b2)
    jax.block_until_ready(out)
    ref = _reference(x, w1, b1, w2, b2)
    assert out.shape == (batch, seq, hidden_size)
    assert jnp.allclose(out, ref, atol=1e-4, rtol=1e-4)

    # Second small check that exercises M padding, I padding and a multi-step
    # reduction axis (grid = (1, 2)).
    b2_, s2_, h2_, i2_ = 1, 5, 32, 600
    k2 = jax.random.split(jax.random.PRNGKey(0), 5)
    x2 = jax.random.normal(k2[0], (b2_, s2_, h2_), dtype=jnp.float32)
    w1_2 = jax.random.normal(k2[1], (h2_, i2_), dtype=jnp.float32) * 0.02
    b1_2 = jax.random.normal(k2[2], (i2_,), dtype=jnp.float32) * 0.02
    w2_2 = jax.random.normal(k2[3], (i2_, h2_), dtype=jnp.float32) * 0.02
    b2_2 = jax.random.normal(k2[4], (h2_,), dtype=jnp.float32) * 0.02

    out2 = siglip_mlp(x2, w1_2, b1_2, w2_2, b2_2)
    jax.block_until_ready(out2)
    ref2 = _reference(x2, w1_2, b1_2, w2_2, b2_2)
    assert out2.shape == (b2_, s2_, h2_)
    assert jnp.allclose(out2, ref2, atol=1e-4, rtol=1e-4)

    print("KERNEL_OK")
</pallas_src>

<mosaic_0001>
module attributes {stable_mosaic.version = 11 : i64} {
  func.func @siglip_mlp_kernel(%arg0: i32, %arg1: i32, %arg2: memref<16x32xf32, #tpu.memory_space<vmem>>, %arg3: memref<32x64xf32, #tpu.memory_space<vmem>>, %arg4: memref<1x64xf32, #tpu.memory_space<vmem>>, %arg5: memref<64x32xf32, #tpu.memory_space<vmem>>, %arg6: memref<1x32xf32, #tpu.memory_space<vmem>>, %arg7: memref<16x32xf32, #tpu.memory_space<vmem>>, %arg8: memref<16x32xf32, #tpu.memory_space<vmem>>) attributes {dimension_semantics = [#tpu.dimension_semantics<parallel>, #tpu.dimension_semantics<arbitrary>], iteration_bounds = array<i64: 1, 1>, scalar_prefetch = 0 : i64, scratch_operands = 1 : i64, tpu.core_type = #tpu.core_type<tc>, window_params = [{transform_indices = @transform_0, window_bounds = array<i64: 16, 32>}, {transform_indices = @transform_1, window_bounds = array<i64: 32, 64>}, {transform_indices = @transform_2, window_bounds = array<i64: 1, 64>}, {transform_indices = @transform_3, window_bounds = array<i64: 64, 32>}, {pipeline_mode = #tpu.pipeline_mode<synchronous>, transform_indices = @transform_4, window_bounds = array<i64: 1, 32>}, {transform_indices = @transform_5, window_bounds = array<i64: 16, 32>}]} {
    %c0_i32 = arith.constant 0 : i32
    %0 = arith.cmpi eq, %arg1, %c0_i32 : i32
    %1 = arith.extui %0 : i1 to i32
    %c0_i32_0 = arith.constant 0 : i32
    %2 = arith.cmpi ne, %1, %c0_i32_0 : i32
    scf.if %2 {
      %cst_19 = arith.constant 0.000000e+00 : f32
      %30 = vector.broadcast %cst_19 : f32 to vector<16x32xf32>
      %c0_20 = arith.constant 0 : index
      %c0_21 = arith.constant 0 : index
      %31 = vector.load %arg8[%c0_20, %c0_21] : memref<16x32xf32, #tpu.memory_space<vmem>>, vector<16x32xf32>
      tpu.vector_store %arg8[%c0_20, %c0_21], %30 {strides = array<i32>} : memref<16x32xf32, #tpu.memory_space<vmem>>, vector<16x32xf32>,
    } else {
    }
    %c0 = arith.constant 0 : index
    %c0_1 = arith.constant 0 : index
    %3 = vector.load %arg2[%c0, %c0_1] : memref<16x32xf32, #tpu.memory_space<vmem>>, vector<16x32xf32>
    %c0_2 = arith.constant 0 : index
    %c0_3 = arith.constant 0 : index
    %4 = vector.load %arg3[%c0_2, %c0_3] : memref<32x64xf32, #tpu.memory_space<vmem>>, vector<32x64xf32>
    %cst = arith.constant dense<0.000000e+00> : vector<16x64xf32>
    %5 = tpu.matmul %3, %4, %cst {dimension_numbers = #tpu.dot_dimension_numbers<[1], [0], [0], [1], [0, 0, 1, 1], [], []>} : vector<16x32xf32>, vector<32x64xf32>, vector<16x64xf32> -> vector<16x64xf32>
    %c0_4 = arith.constant 0 : index
    %c0_5 = arith.constant 0 : index
    %6 = vector.load %arg4[%c0_4, %c0_5] : memref<1x64xf32, #tpu.memory_space<vmem>>, vector<1x64xf32>
    %7 = vector.broadcast %6 : vector<1x64xf32> to vector<16x64xf32>
    %8 = arith.addf %5, %7 : vector<16x64xf32>
    %cst_6 = arith.constant 5.000000e-01 : f32
    %9 = vector.broadcast %cst_6 : f32 to vector<16x64xf32>
    %10 = arith.mulf %9, %8 : vector<16x64xf32>
    %11 = arith.mulf %8, %8 : vector<16x64xf32>
    %12 = arith.mulf %11, %8 : vector<16x64xf32>
    %cst_7 = arith.constant 4.471500e-02 : f32
    %13 = vector.broadcast %cst_7 : f32 to vector<16x64xf32>
    %14 = arith.mulf %13, %12 : vector<16x64xf32>
    %15 = arith.addf %8, %14 : vector<16x64xf32>
    %cst_8 = arith.constant 0.797884583 : f32
    %16 = vector.broadcast %cst_8 : f32 to vector<16x64xf32>
    %17 = arith.mulf %16, %15 : vector<16x64xf32>
    %18 = math.tanh %17 : vector<16x64xf32>
    %cst_9 = arith.constant 1.000000e+00 : f32
    %19 = vector.broadcast %cst_9 : f32 to vector<16x64xf32>
    %20 = arith.addf %19, %18 : vector<16x64xf32>
    %21 = arith.mulf %10, %20 : vector<16x64xf32>
    %c0_10 = arith.constant 0 : index
    %c0_11 = arith.constant 0 : index
    %22 = vector.load %arg8[%c0_10, %c0_11] : memref<16x32xf32, #tpu.memory_space<vmem>>, vector<16x32xf32>
    %c0_12 = arith.constant 0 : index
    %c0_13 = arith.constant 0 : index
    %23 = vector.load %arg5[%c0_12, %c0_13] : memref<64x32xf32, #tpu.memory_space<vmem>>, vector<64x32xf32>
    %cst_14 = arith.constant dense<0.000000e+00> : vector<16x32xf32>
    %24 = tpu.matmul %21, %23, %cst_14 {dimension_numbers = #tpu.dot_dimension_numbers<[1], [0], [0], [1], [0, 0, 1, 1], [], []>} : vector<16x64xf32>, vector<64x32xf32>, vector<16x32xf32> -> vector<16x32xf32>
    %25 = arith.addf %22, %24 : vector<16x32xf32>
    %c0_15 = arith.constant 0 : index
    %c0_16 = arith.constant 0 : index
    %26 = vector.load %arg8[%c0_15, %c0_16] : memref<16x32xf32, #tpu.memory_space<vmem>>, vector<16x32xf32>
    tpu.vector_store %arg8[%c0_15, %c0_16], %25 {strides = array<i32>} : memref<16x32xf32, #tpu.memory_space<vmem>>, vector<16x32xf32>,
    %c0_i32_17 = arith.constant 0 : i32
    %27 = arith.cmpi eq, %arg1, %c0_i32_17 : i32
    %28 = arith.extui %27 : i1 to i32
    %c0_i32_18 = arith.constant 0 : i32
    %29 = arith.cmpi ne, %28, %c0_i32_18 : i32
    scf.if %29 {
      %c0_19 = arith.constant 0 : index
      %c0_20 = arith.constant 0 : index
      %30 = vector.load %arg8[%c0_19, %c0_20] : memref<16x32xf32, #tpu.memory_space<vmem>>, vector<16x32xf32>
      %c0_21 = arith.constant 0 : index
      %c0_22 = arith.constant 0 : index
      %31 = vector.load %arg6[%c0_21, %c0_22] : memref<1x32xf32, #tpu.memory_space<vmem>>, vector<1x32xf32>
      %32 = vector.broadcast %31 : vector<1x32xf32> to vector<16x32xf32>
      %33 = arith.addf %30, %32 : vector<16x32xf32>
      %c0_23 = arith.constant 0 : index
      %c0_24 = arith.constant 0 : index
      %34 = vector.load %arg7[%c0_23, %c0_24] : memref<16x32xf32, #tpu.memory_space<vmem>>, vector<16x32xf32>
      tpu.vector_store %arg7[%c0_23, %c0_24], %33 {strides = array<i32>} : memref<16x32xf32, #tpu.memory_space<vmem>>, vector<16x32xf32>,
    } else {
    }
    return
  }
  func.func @transform_0(%arg0: i32, %arg1: i32) -> (i32, i32) {
    %c0_i32 = arith.constant 0 : i32
    %c0_i32_0 = arith.constant 0 : i32
    return %arg0, %c0_i32 : i32, i32
  }
  func.func @transform_1(%arg0: i32, %arg1: i32) -> (i32, i32) {
    %c0_i32 = arith.constant 0 : i32
    %c0_i32_0 = arith.constant 0 : i32
    return %c0_i32, %arg1 : i32, i32
  }
  func.func @transform_2(%arg0: i32, %arg1: i32) -> (i32, i32) {
    %c0_i32 = arith.constant 0 : i32
    %c0_i32_0 = arith.constant 0 : i32
    return %c0_i32, %arg1 : i32, i32
  }
  func.func @transform_3(%arg0: i32, %arg1: i32) -> (i32, i32) {
    %c0_i32 = arith.constant 0 : i32
    %c0_i32_0 = arith.constant 0 : i32
    return %arg1, %c0_i32 : i32, i32
  }
  func.func @transform_4(%arg0: i32, %arg1: i32) -> (i32, i32) {
    %c0_i32 = arith.constant 0 : i32
    %c0_i32_0 = arith.constant 0 : i32
    %c0_i32_1 = arith.constant 0 : i32
    return %c0_i32, %c0_i32_0 : i32, i32
  }
  func.func @transform_5(%arg0: i32, %arg1: i32) -> (i32, i32) {
    %c0_i32 = arith.constant 0 : i32
    %c0_i32_0 = arith.constant 0 : i32
    return %arg0, %c0_i32 : i32, i32
  }
}

</mosaic_0001>

<bundles_post_ra>
// kernel: tpu_custom_call.1
= control target key start
LH: loop header
LB: loop body
LE: loop exit
PB: predicated region body
PF: predicated region fallthrough
CT: control target
= control target key end

     0   :  { %10 = vsyncpa [#allocation4], 0  ;;  %s703_s0 = inlined_call_operand.hbm [shape: f32[16,32], index: 0, kind: input, shape index: {}]   ;;  %s704_s1 = inlined_call_operand.hbm [shape: f32[32,64], index: 1, kind: input, shape index: {}]   ;;  %s705_s2 = inlined_call_operand.hbm [shape: f32[1,64], index: 2, kind: input, shape index: {}]   ;;  %s706_s3 = inlined_call_operand.hbm [shape: f32[64,32], index: 3, kind: input, shape index: {}]   ;;  %s707_s4 = inlined_call_operand.hbm [shape: f32[1,32], index: 4, kind: input, shape index: {}]   ;;  %s708_s5 = inlined_call_operand.hbm [shape: f32[16,32], index: 5, kind: output, shape index: {}]  }
   0x1   :  { %11 = vsyncpa [#allocation7], 0 }
   0x2   :  { %12 = vsyncpa [#allocation10], 0 }
   0x3   :  { %13 = vsyncpa [#allocation5], 0  ;;  %s565_s18 = smov [#allocation6]   ;;  %s566_s20 = smov [#allocation9]  }
   0x4   :  { %s31_s19 = sshll.u32 %s565_s18, 4  ;;  %s53_s21 = sshll.u32 %s566_s20, 4  ;;  %s32_s19 = int_to_ptr.vmem [resolvable:$true] %s31_s19  ;;  %s604_s21 = int_to_ptr.vmem [resolvable:$true] %s53_s21 }
   0x5   :  { %s425_s24 = scalar_lea.hbm %s704_s1, 512 }
   0x6   :  { %p426_p0 = scmp.ne.s32.totalorder %s704_s1, %s425_s24  ;;  %p429_p1 = scmp.lt.u32.totalorder %s425_s24, %s704_s1 }
   0x8   :  { %p431_p2 = pnand %p429_p1, %p426_p0 }
   0xa   :  { %434 = shalt.err (!%p431_p2)
}
   0xb   :  { %s435_s29 = scalar_lea.vmem %s32_s19, 512  ;;  %p440_p4 = scmp.lt.s32.totalorder %s32_s19, %s32_s19 }
   0xc   :  { %p436_p3 = scmp.ne.s32.totalorder %s32_s19, %s435_s29  ;;  %p441_p5 = scmp.lt.s32.totalorder %s435_s29, %s435_s29 }
   0xe   :  { %p442_p6 = por %p441_p5, %p440_p4 }
  0x10   :  { %p443_p7 = pnand %p442_p6, %p436_p3 }
  0x12   :  { %446 = shalt.err (!%p443_p7)
}
  0x13   :  { %s567_s30 = smov 128   ;;  %s568_s6 = smov 8  }
  0x14   :  { %37 = dma.hbm_to_vmem [thread:$0]  %s704_s1, 512, %s32_s19, [#allocation7], %s567_s30, %s567_s30, %s568_s6  }
  0x15   :  { %s447_s11 = scalar_lea.hbm %s706_s3, 1024 }
  0x16   :  { %p448_p8 = scmp.ne.s32.totalorder %s706_s3, %s447_s11  ;;  %p451_p9 = scmp.lt.u32.totalorder %s447_s11, %s706_s3 }
  0x18   :  { %p453_p10 = pnand %p451_p9, %p448_p8 }
  0x1a   :  { %456 = shalt.err (!%p453_p10)
}
  0x1b   :  { %s457_s16 = scalar_lea.vmem %s604_s21, 1024  ;;  %p462_p12 = scmp.lt.s32.totalorder %s604_s21, %s604_s21 }
  0x1c   :  { %p458_p11 = scmp.ne.s32.totalorder %s604_s21, %s457_s16  ;;  %p463_p13 = scmp.lt.s32.totalorder %s457_s16, %s457_s16 }
  0x1e   :  { %p464_p0 = por %p463_p13, %p462_p12 }
  0x20   :  { %p465_p1 = pnand %p464_p0, %p458_p11 }
  0x22   :  { %468 = shalt.err (!%p465_p1)
}
  0x23   :  { %59 = dma.hbm_to_vmem [thread:$0]  %s706_s3, 1024, %s604_s21, [#allocation10], %s567_s30, %s567_s30, %s568_s6  }
  0x24   :  { %s569_s18 = smov [#allocation3]   ;;  %s570_s20 = smov [#allocation8]  }
  0x25   :  { %s19_s19 = sshll.u32 %s569_s18, 4  ;;  %s44_s22 = sshll.u32 %s570_s20, 4  ;;  %s20_s19 = int_to_ptr.vmem [resolvable:$true] %s19_s19  ;;  %s45_s22 = int_to_ptr.vmem [resolvable:$true] %s44_s22 }
  0x26   :  { %s469_s25 = scalar_lea.hbm %s703_s0, 256 }
  0x27   :  { %p470_p2 = scmp.ne.s32.totalorder %s703_s0, %s469_s25  ;;  %p473_p3 = scmp.lt.u32.totalorder %s469_s25, %s703_s0 }
  0x29   :  { %p475_p4 = pnand %p473_p3, %p470_p2 }
  0x2b   :  { %478 = shalt.err (!%p475_p4)
}
  0x2c   :  { %s479_s3 = scalar_lea.vmem %s20_s19, 256  ;;  %p484_p6 = scmp.lt.s32.totalorder %s20_s19, %s20_s19 }
  0x2d   :  { %p480_p5 = scmp.ne.s32.totalorder %s20_s19, %s479_s3  ;;  %p485_p7 = scmp.lt.s32.totalorder %s479_s3, %s479_s3 }
  0x2f   :  { %p486_p8 = por %p485_p7, %p484_p6 }
  0x31   :  { %p487_p9 = pnand %p486_p8, %p480_p5 }
  0x33   :  { %490 = shalt.err (!%p487_p9)
}
  0x34   :  { %25 = dma.hbm_to_vmem [thread:$0]  %s703_s0, 256, %s20_s19, [#allocation4], %s567_s30, %s567_s30, %s568_s6  }
  0x35   :  { %s491_s10 = scalar_lea.hbm %s705_s2, 16 }
  0x36   :  { %p492_p10 = scmp.ne.s32.totalorder %s705_s2, %s491_s10  ;;  %p495_p11 = scmp.lt.u32.totalorder %s491_s10, %s705_s2 }
  0x38   :  { %p497_p12 = pnand %p495_p11, %p492_p10 }
  0x3a   :  { %500 = shalt.err (!%p497_p12)
}
  0x3b   :  { %s501_s15 = scalar_lea.vmem %s45_s22, 16  ;;  %s505_s16 = scalar_lea.vmem %s45_s22, 32 }
  0x3c   :  { %p502_p13 = scmp.ne.s32.totalorder %s45_s22, %s501_s15  ;;  %p506_p0 = scmp.lt.s32.totalorder %s45_s22, %s45_s22 }
  0x3d   :  { %p507_p1 = scmp.lt.s32.totalorder %s505_s16, %s501_s15 }
  0x3f   :  { %p508_p2 = por %p507_p1, %p506_p0 }
  0x41   :  { %p509_p3 = pnand %p508_p2, %p502_p13 }
  0x43   :  { %512 = shalt.err (!%p509_p3)
}
  0x44   :  { %47 = dma.hbm_to_vmem [thread:$0]  %s705_s2, 16, %s45_s22, [#allocation7]  }
  0x45   :  { %s571_s17 = smov [#allocation11]   ;;  %s513_s23 = scalar_lea.hbm %s707_s4, 16 }
  0x46   :  { %s66_s18 = sshll.u32 %s571_s17, 4  ;;  %p514_p4 = scmp.ne.s32.totalorder %s707_s4, %s513_s23  ;;  %s67_s18 = int_to_ptr.vmem [resolvable:$true] %s66_s18 }
  0x47   :  { %p517_p5 = scmp.lt.u32.totalorder %s513_s23, %s707_s4 }
  0x49   :  { %p519_p6 = pnand %p517_p5, %p514_p4 }
  0x4b   :  { %522 = shalt.err (!%p519_p6)
}
  0x4c   :  { %s523_s28 = scalar_lea.vmem %s67_s18, 16  ;;  %s527_s2 = scalar_lea.vmem %s67_s18, 32 }
  0x4d   :  { %p524_p7 = scmp.ne.s32.totalorder %s67_s18, %s523_s28  ;;  %p528_p8 = scmp.lt.s32.totalorder %s67_s18, %s67_s18 }
  0x4e   :  { %p529_p9 = scmp.lt.s32.totalorder %s527_s2, %s523_s28 }
  0x50   :  { %p530_p10 = por %p529_p9, %p528_p8 }
  0x52   :  { %p531_p11 = pnand %p530_p10, %p524_p7 }
  0x54   :  { %534 = shalt.err (!%p531_p11)
}
  0x55   :  { %69 = dma.hbm_to_vmem [thread:$0]  %s707_s4, 16, %s67_s18, [#allocation10]  }
  0x56   :  { %557 = dma.done.wait [#allocation4], 256  }
  0x57   :  { %558 = vsyncadd [#allocation4], 4294967040 }
  0x58   :  { %559 = dma.done.wait [#allocation7], 528  }
  0x59   :  { %560 = vsyncadd [#allocation7], 4294966768 }
  0x5a   :  { %561 = dma.done.wait [#allocation10], 1040  }
  0x5b   :  { %562 = vsyncadd [#allocation10], 4294966256  ;;  %vm89_vm0 = vcmask 261120   ;;  %v94_v0 = vld [vmem:[#allocation6] sm:$0xff]  ;;  %v95_v1 = vld [vmem:[#allocation6 + $0x8] sm:$0xff]  ;;  %v572_v20 = vmov 0.0  }
  0x5c   :  { %v96_v2 = vld [vmem:[#allocation6 + $0x10] sm:$0xff]  ;;  %v388_v3 = vpack.c.bf16 %v95_v1, %v94_v0  ;;  %v97_v4 = vld [vmem:[#allocation6 + $0x18] sm:$0xff]  ;;  %v207_v8 = vld [vmem:[#allocation9] sm:$0xff]  ;;  %91 = vst.msk [vmem:[#allocation2 + $0x8] sm:$0xff] %vm89_vm0, %v572_v20  ;;  %vm215_vm1 = vcmask 523264   ;;  %s573_s4 = smov [#allocation12]  }
  0x5d   :  { %v92_v5 = vld [vmem:[#allocation3] sm:$0xff]  ;;  %v392_v6 = vpack.c.bf16 %v97_v4, %v96_v2  ;;  %v93_v7 = vld [vmem:[#allocation3 + $0x8] sm:$0xff]  ;;  %v211_v13 = vld [vmem:[#allocation9 + $0x20] sm:$0xff]  ;;  %90 = vst.msk [vmem:[#allocation2] sm:$0xff] %vm89_vm0, %v572_v20  ;;  %s322_s3 = sshll.u32 %s573_s4, 4  ;;  %s323_s3 = int_to_ptr.vmem [resolvable:$true] %s322_s3 }
  0x5e   :  { %366 = vmatprep.mubr.msk.f32.mxu0 %vm89_vm0, %v92_v5  ;;  %389 = vmatprep.subr.bf16.mxu0 %v388_v3  ;;  %v208_v9 = vld [vmem:[#allocation9 + $0x8] sm:$0xff]  ;;  %v209_v11 = vld [vmem:[#allocation9 + $0x10] sm:$0xff]  ;;  %v210_v12 = vld [vmem:[#allocation9 + $0x18] sm:$0xff]  ;;  %s535_s21 = scalar_lea.vmem %s323_s3, 256  ;;  %p540_p13 = scmp.lt.s32.totalorder %s323_s3, %s323_s3 }
  0x5f   :  { %391 = vmatpush3.bf16.msra.mxu0 %v388_v3  ;;  %v396_v10 = vpack.c.bf16 %v208_v9, %v207_v8  ;;  %v400_v14 = vpack.c.bf16 %v210_v12, %v209_v11  ;;  %v212_v15 = vld [vmem:[#allocation9 + $0x28] sm:$0xff]  ;;  %v213_v17 = vld [vmem:[#allocation9 + $0x30] sm:$0xff]  ;;  %v214_v18 = vld [vmem:[#allocation9 + $0x38] sm:$0xff]  ;;  %p536_p12 = scmp.ne.s32.totalorder %s323_s3, %s535_s21  ;;  %p541_p0 = scmp.lt.s32.totalorder %s535_s21, %s535_s21 }
  0x60   :  { %393 = vmatprep.subr.bf16.mxu0 %v392_v6  ;;  %v404_v16 = vpack.c.bf16 %v212_v15, %v211_v13  ;;  %v408_v19 = vpack.c.bf16 %v214_v18, %v213_v17  ;;  %v336_v21 = vld [vmem:[#allocation8] ss:$0 sm:$0xff]  ;;  %v341_v50 = vld [vmem:[#allocation11] ss:$0 sm:$0xff] }
  0x61   :  { %397 = vmatprep.subr.bf16.mxu1 %v396_v10  ;;  %p542_p1 = por %p541_p0, %p540_p13 }
  0x62   :  { %399 = vmatpush3.bf16.msra.mxu1 %v396_v10 }
  0x63   :  { %395 = vmatpush3.bf16.msra.mxu0 %v392_v6  ;;  %401 = vmatprep.subr.bf16.mxu1 %v400_v14  ;;  %v206_v44 = vld [vmem:[#allocation2 + $0x8] sm:$0xff]  ;;  %p543_p2 = pnand %p542_p1, %p536_p12 }
  0x64   :  { %v205_v45 = vld [vmem:[#allocation2] sm:$0xff] }
  0x66   :  { %367 = vmatmul.mubr.msk.f32.vlgmr.msra.gmra.mrb[0].mxu0 %vm89_vm0, %v93_v7  ;;  %403 = vmatpush3.bf16.msra.mxu1 %v400_v14 }
  0x67   :  { %405 = vmatprep.subr.bf16.mxu1 %v404_v16 }
  0x6a   :  { %407 = vmatpush3.bf16.msra.mxu1 %v404_v16 }
  0x6b   :  { %409 = vmatprep.subr.bf16.mxu1 %v408_v19 }
  0x6e   :  { %411 = vmatpush3.bf16.msra.mxu1 %v408_v19 }
 0x139   :  { %v368_v22 = vpop.f32.mrb[0].mxu0 }
 0x13a   :  { %v184_v23 = vadd.f32 %v368_v22, %v336_v21  ;;  %v178_v24 = vpop.f32.mrb[1].mxu0 }
 0x13b   :  { %v179_v25 = vadd.f32 %v336_v21, %v178_v24 }
 0x13c   :  { %v190_v26 = vmul.f32 %v184_v23, %v184_v23  ;;  %v188_v41 = vmul.f32 0.5, %v184_v23 }
 0x13d   :  { %v189_v27 = vmul.f32 %v179_v25, %v179_v25  ;;  %v187_v39 = vmul.f32 0.5, %v179_v25 }
 0x13e   :  { %v192_v28 = vmul.f32 %v190_v26, %v184_v23 }
 0x13f   :  { %v191_v29 = vmul.f32 %v189_v27, %v179_v25 }
 0x140   :  { %v194_v30 = vmul.f32 0.044715, %v192_v28 }
 0x141   :  { %v193_v31 = vmul.f32 0.044715, %v191_v29 }
 0x142   :  { %v196_v32 = vadd.f32 %v194_v30, %v184_v23 }
 0x143   :  { %v195_v33 = vadd.f32 %v193_v31, %v179_v25 }
 0x144   :  { %v198_v34 = vmul.f32 0.7978846, %v196_v32 }
 0x145   :  { %v197_v35 = vmul.f32 0.7978846, %v195_v33 }
 0x146   :  { %421 = vtanh.f32 %v198_v34 }
 0x147   :  { %423 = vtanh.f32 %v197_v35 }
 0x150   :  { %v422_v36 = vpop.eup %421 }
 0x151   :  { %v424_v37 = vpop.eup %423  ;;  %v202_v38 = vadd.f32 1.0, %v422_v36 }
 0x152   :  { %v201_v40 = vadd.f32 1.0, %v424_v37 }
 0x153   :  { %v204_v43 = vmul.f32 %v202_v38, %v188_v41 }
 0x154   :  { %v203_v42 = vmul.f32 %v201_v40, %v187_v39 }
 0x156   :  { %385 = vmatprep.mubr.msk.f32.mxu1 %vm215_vm1, %v203_v42 }
 0x157   :  { %386 = vmatmul.mubr.msk.f32.vlgmr.msra.gmra.mrb[0].mxu1 %vm215_vm1, %v204_v43 }
 0x22a   :  { %v387_v46 = vpop.f32.mrb[0].mxu1 }
 0x22b   :  { %v298_v47 = vadd.f32 %v387_v46, %v206_v44  ;;  %v288_v48 = vpop.f32.mrb[1].mxu1 }
 0x22c   :  { %v297_v49 = vadd.f32 %v288_v48, %v205_v45 }
 0x22d   :  { %300 = vst.msk [vmem:[#allocation2 + $0x8] sm:$0xff] %vm89_vm0, %v298_v47 }
 0x22e   :  { %299 = vst.msk [vmem:[#allocation2] sm:$0xff] %vm89_vm0, %v297_v49 }
 0x234   :  { %v305_v51 = vld [vmem:[#allocation2 + $0x8] sm:$0xff] }
 0x235   :  { %v304_v52 = vld [vmem:[#allocation2] sm:$0xff]  ;;  %v314_v53 = vadd.f32 %v341_v50, %v305_v51 }
 0x236   :  { %v313_v54 = vadd.f32 %v341_v50, %v304_v52 }
 0x237   :  { %316 = vst.msk [vmem:[#allocation12 + $0x8] sm:$0xff] %vm89_vm0, %v314_v53 }
 0x238   :  { %315 = vst.msk [vmem:[#allocation12] sm:$0xff] %vm89_vm0, %v313_v54 }
 0x239   :  { %546 = shalt.err (!%p543_p2)
}
 0x23a   :  { %s547_s9 = scalar_lea.hbm %s708_s5, 256 }
 0x23b   :  { %p548_p3 = scmp.ne.s32.totalorder %s708_s5, %s547_s9  ;;  %p551_p4 = scmp.lt.u32.totalorder %s547_s9, %s708_s5 }
 0x23d   :  { %p553_p5 = pnand %p551_p4, %p548_p3 }
 0x23f   :  { %556 = shalt.err (!%p553_p5)
}
 0x240   :  { %328 = dma.vmem_to_hbm [thread:$0]  %s323_s3, 256, %s708_s5, [#allocation5], %s567_s30, %s567_s30, %s568_s6  }
 0x241   :  { %563 = dma.done.wait [#allocation5], 256  }
 0x242   :  { %564 = vsyncadd [#allocation5], 4294967040 }
 0x243   :  { %332 = vsyncpa [#allocation4], 1 }
 0x244   :  { %333 = vsyncpa [#allocation7], 1 }
 0x245   :  { %334 = vsyncpa [#allocation10], 1 }
 0x246   :  { %335 = vsyncpa [#allocation5], 1 }

</bundles_post_ra>
